<compile_context>
chip_gen: v6e
topology: v6e:2x2x1
jax: 0.10.0
libtpu: 0.0.40
codegen_flags: <defaults>
</compile_context>

<pallas_src>
import jax
import jax.numpy as jnp
from jax.experimental import pallas as pl
from jax.experimental.pallas import tpu as pltpu


_SMALL_B = 8192    # at or below this, skip the grid entirely (single VMEM tile)
_TB = 4096         # batch tile for the gridded (large-B) path


def _fused_kernel(x_ref, w_ref, b_ref, o_ref):
    # x_ref: [TB, 20]   w_ref: [20, 50]   b_ref: [1, 50]   o_ref: [TB, 50]
    # Single MXU contraction + bias add; f32 accumulation.
    o_ref[...] = (
        jnp.dot(x_ref[...], w_ref[...], preferred_element_type=jnp.float32)
        + b_ref[...]
    )


def _fold_params(weight, bias, large_tensor, dup_large_tensor):
    """Fold the affine chain into one combined weight/bias, outside the kernel."""
    proj = large_tensor + dup_large_tensor                 # [30, 50]
    w_comb = weight.T @ proj                               # [20, 50]
    b_comb = ((bias + jnp.float32(1.0)) @ proj)[None, :]   # [1, 50]
    return w_comb, b_comb


@jax.jit
def simple_params_forward(x, weight, bias, large_tensor, dup_large_tensor):
    """x: [B, 20] f32; weight: [30, 20]; bias: [30]; large/dup: [30, 50]."""
    B, K = x.shape
    w_comb, b_comb = _fold_params(weight, bias, large_tensor, dup_large_tensor)
    N = w_comb.shape[1]   # 50 — written at true width (block dim == full array dim)

    vmem = pltpu.MemorySpace.VMEM

    if B <= _SMALL_B:
        # Whole problem in a single VMEM tile: no grid, no pipelining bookkeeping.
        return pl.pallas_call(
            _fused_kernel,
            out_shape=jax.ShapeDtypeStruct((B, N), jnp.float32),
            in_specs=[
                pl.BlockSpec(memory_space=vmem),
                pl.BlockSpec(memory_space=vmem),
                pl.BlockSpec(memory_space=vmem),
            ],
            out_specs=pl.BlockSpec(memory_space=vmem),
        )(x, w_comb, b_comb)

    # Large batch: tile the batch (>=3 tiles whenever we get here, so both
    # v7x TensorCores see work). No pre-padding of x — Pallas handles the
    # ragged last block (padded reads, OOB writes dropped).
    n_tiles = pl.cdiv(B, _TB)
    return pl.pallas_call(
        _fused_kernel,
        out_shape=jax.ShapeDtypeStruct((B, N), jnp.float32),
        grid=(n_tiles,),
        in_specs=[
            pl.BlockSpec((_TB, K), lambda i: (i, 0)),
            pl.BlockSpec((K, N), lambda i: (0, 0)),   # weights stay resident
            pl.BlockSpec((1, N), lambda i: (0, 0)),
        ],
        out_specs=pl.BlockSpec((_TB, N), lambda i: (i, 0)),
        compiler_params=pltpu.CompilerParams(
            dimension_semantics=("parallel",)
        ),
    )(x, w_comb, b_comb)


if __name__ == "__main__":
    key = jax.random.PRNGKey(0)
    k_x, k_w, k_b, k_lt, k_dlt, k_x2 = jax.random.split(key, 6)

    # Deterministic synthetic parameters (shapes from module __init__).
    bound = 1.0 / jnp.sqrt(20.0)
    weight = jax.random.uniform(k_w, (30, 20), jnp.float32, -bound, bound)
    bias = jax.random.uniform(k_b, (30,), jnp.float32, -bound, bound)
    large_tensor = jax.random.uniform(k_lt, (30, 50), jnp.float32)       # torch.rand
    dup_large_tensor = jax.random.uniform(k_dlt, (30, 50), jnp.float32)  # torch.rand

    def reference(xx):
        return (xx @ weight.T + bias + 1.0) @ (large_tensor + dup_large_tensor)

    # Small-batch path (grid-free, true-width output).
    x_small = jax.random.normal(k_x, (8, 20), jnp.float32)
    out_small = jax.block_until_ready(
        simple_params_forward(x_small, weight, bias, large_tensor, dup_large_tensor))
    assert out_small.shape == (8, 50)
    assert jnp.allclose(out_small, reference(x_small), atol=1e-3, rtol=1e-3)

    # Large-batch path (parallel batch grid, ragged last tile), for coverage.
    x_large = jax.random.normal(k_x2, (9001, 20), jnp.float32)
    out_large = jax.block_until_ready(
        simple_params_forward(x_large, weight, bias, large_tensor, dup_large_tensor))
    assert out_large.shape == (9001, 50)
    assert jnp.allclose(out_large, reference(x_large), atol=1e-3, rtol=1e-3)

    print("KERNEL_OK")
</pallas_src>

<mosaic_0001>
module attributes {stable_mosaic.version = 11 : i64} {
  func.func @_fused_kernel(%arg0: memref<8x20xf32, #tpu.memory_space<vmem>>, %arg1: memref<20x50xf32, #tpu.memory_space<vmem>>, %arg2: memref<1x50xf32, #tpu.memory_space<vmem>>, %arg3: memref<8x50xf32, #tpu.memory_space<vmem>>) attributes {dimension_semantics = [], scalar_prefetch = 0 : i64, scratch_operands = 0 : i64, tpu.core_type = #tpu.core_type<tc>} {
    %c0 = arith.constant 0 : index
    %c0_0 = arith.constant 0 : index
    %0 = vector.load %arg0[%c0, %c0_0] : memref<8x20xf32, #tpu.memory_space<vmem>>, vector<8x20xf32>
    %c0_1 = arith.constant 0 : index
    %c0_2 = arith.constant 0 : index
    %1 = vector.load %arg1[%c0_1, %c0_2] : memref<20x50xf32, #tpu.memory_space<vmem>>, vector<20x50xf32>
    %cst = arith.constant dense<0.000000e+00> : vector<8x50xf32>
    %2 = tpu.matmul %0, %1, %cst {dimension_numbers = #tpu.dot_dimension_numbers<[1], [0], [0], [1], [0, 0, 1, 1], [], []>} : vector<8x20xf32>, vector<20x50xf32>, vector<8x50xf32> -> vector<8x50xf32>
    %c0_3 = arith.constant 0 : index
    %c0_4 = arith.constant 0 : index
    %3 = vector.load %arg2[%c0_3, %c0_4] : memref<1x50xf32, #tpu.memory_space<vmem>>, vector<1x50xf32>
    %4 = vector.broadcast %3 : vector<1x50xf32> to vector<8x50xf32>
    %5 = arith.addf %2, %4 : vector<8x50xf32>
    %c0_5 = arith.constant 0 : index
    %c0_6 = arith.constant 0 : index
    %6 = vector.load %arg3[%c0_5, %c0_6] : memref<8x50xf32, #tpu.memory_space<vmem>>, vector<8x50xf32>
    tpu.vector_store %arg3[%c0_5, %c0_6], %5 {strides = array<i32>} : memref<8x50xf32, #tpu.memory_space<vmem>>, vector<8x50xf32>,
    return
  }
}

</mosaic_0001>

<bundles_post_ra>
// kernel: simple_params_forward.1
= control target key start
LH: loop header
LB: loop body
LE: loop exit
PB: predicated region body
PF: predicated region fallthrough
CT: control target
= control target key end

     0   :  { %vm30_vm0 = vcmask 1043456   ;;  %v161_v1 = vmov 0.0   ;;  %vm162_vm1 = vmmov 0   ;;  %s202_s0 = inlined_call_operand.vmem [shape: f32[8,20], index: 0, kind: input, shape index: {}]   ;;  %s203_s1 = inlined_call_operand.vmem [shape: f32[20,50], index: 1, kind: input, shape index: {}]   ;;  %s204_s2 = inlined_call_operand.vmem [shape: f32[1,50], index: 2, kind: input, shape index: {}]   ;;  %s205_s3 = inlined_call_operand.hbm [shape: f32[8,50], index: 3, kind: output, shape index: {}]  }
   0x1   :  { %v18_v0 = vld [vmem:[%s203_s1 + $0x10] sm:$0xf]  ;;  %127 = vmatprep.subr.mxu0 %v161_v1  ;;  %v17_v2 = vld [vmem:[%s203_s1 + $0x8] sm:$0xff]  ;;  %133 = vmatprep.mubr.msk.f32.mxu0 %vm162_vm1, %v161_v1 }
   0x2   :  { %128 = vmatpush3.msk.msra.mxu0 %vm30_vm0, %v18_v0 }
   0x3   :  { %8 = vsyncpa [#allocation3], 0  ;;  %129 = vmatprep.subr.mxu0 %v161_v1  ;;  %v16_v3 = vld [vmem:[%s203_s1] sm:$0xff]  ;;  %vm26_vm2 = vcmask 162816   ;;  %s163_s22 = smov [#allocation2]   ;;  %vm104_vm3 = vcmask 408576  }
   0x4   :  { %130 = vmatpush3.msra.mxu0 %v17_v2  ;;  %v15_v4 = vld [vmem:[%s202_s0] sm:$0xff]  ;;  %s112_s23 = sshll.u32 %s163_s22, 4  ;;  %s113_s23 = int_to_ptr.vmem [resolvable:$true] %s112_s23 }
   0x5   :  { %131 = vmatprep.subr.mxu0 %v161_v1  ;;  %v120_v5 = vld [vmem:[%s204_s2] ss:$0 sm:$0xff]  ;;  %s139_s1 = scalar_lea.vmem %s113_s23, 128  ;;  %p144_p1 = scmp.lt.s32.totalorder %s113_s23, %s113_s23 }
   0x6   :  { %132 = vmatpush3.msra.mxu0 %v16_v3  ;;  %p140_p0 = scmp.ne.s32.totalorder %s113_s23, %s139_s1  ;;  %p145_p2 = scmp.lt.s32.totalorder %s139_s1, %s139_s1 }
   0x7   :  { %134 = vmatmul.mubr.msk.f32.vlgmr.msra.gmra.mxu0 %vm26_vm2, %v15_v4 }
   0x8   :  { %p146_p3 = por %p145_p2, %p144_p1 }
   0xa   :  { %p147_p4 = pnand %p146_p3, %p140_p0 }
  0xc7   :  { %v100_v6 = vpop.f32.mrf.mxu0 }
  0xc8   :  { %v101_v7 = vadd.f32 %v120_v5, %v100_v6 }
  0xc9   :  { %v135_v8 = vpop.f32.mrf.mxu0 }
  0xca   :  { %105 = vst.msk [vmem:[#allocation2] sm:$0xff] %vm104_vm3, %v101_v7 }
  0xcb   :  { %150 = shalt.err (!%p147_p4)
}
  0xcc   :  { %115 = dma.vmem_to_hbm [thread:$0]  %s113_s23, 128, %s205_s3, [#allocation3]  }
  0xcd   :  { %159 = dma.done.wait [#allocation3], 128  }
  0xce   :  { %160 = vsyncadd [#allocation3], 4294967168 }
  0xcf   :  { %119 = vsyncpa [#allocation3], 1 }

</bundles_post_ra>
